<compile_context>
chip_gen: v5e
topology: v5e:2x2
jax: 0.10.0
libtpu: 0.0.40
codegen_flags: <defaults>
</compile_context>

<pallas_src>
import functools
import math

import jax
import jax.numpy as jnp
from jax.experimental import pallas as pl
from jax.experimental.pallas import tpu as pltpu


# ----------------------------------------------------------------------------- #
# Kernel
# ----------------------------------------------------------------------------- #
def _tores_kernel(wlat_ref, aw_ref, ab_ref, x_ref, wt_ref, b_ref, *rest,
                  has_res, clamp, mxu_dtype):
    """Fused ToResLayer for one (batch, hw-tile) grid step.

    wlat: (1, 1, w_dim)   latent for this batch element (f32)
    aw:   (w_dim, Cin)    affine weight, pre-transposed, gains pre-folded (f32)
    ab:   (1, Cin)        affine bias, gains pre-folded (f32)
    x:    (1, Cin, hw)    activations (input dtype; cast to bf16 in-register for the MXU)
    wt:   (Cout, Cin)     ToRes weight (f32)
    b:    (Cout, 1)       ToRes bias (f32)
    [res: (1, Cout, hw)]  optional residual to accumulate (f32)
    out:  (1, Cout, hw)   f32
    """
    if has_res:
        res_ref, o_ref = rest
    else:
        (o_ref,) = rest

    # styles = affine(w); 1/sqrt(w_dim) and 1/sqrt(Cin) gains are already folded into aw/ab.
    s = jnp.dot(wlat_ref[0], aw_ref[...],
                preferred_element_type=jnp.float32)                      # (1, Cin)
    s = s + ab_ref[...]                                                  # (1, Cin)

    # Modulate the small shared weight (cheaper than scaling the x tile), cast for the MXU.
    w_mod = (wt_ref[...] * s).astype(mxu_dtype)                          # (Cout, Cin)

    # Main matmul on the MXU, f32 accumulation.  x is cast in-register (no extra HBM pass).
    y = jnp.dot(w_mod, x_ref[0].astype(mxu_dtype),
                preferred_element_type=jnp.float32)                      # (Cout, hw)

    # bias_act (linear activation + clamp) in f32, optional fused residual add.
    y = y + b_ref[...]
    if clamp is not None:
        y = jnp.clip(y, -clamp, clamp)
    if has_res:
        y = y + res_ref[0].astype(jnp.float32)
    o_ref[0] = y.astype(o_ref.dtype)


# ----------------------------------------------------------------------------- #
# Wrapper
# ----------------------------------------------------------------------------- #
def _pick_hw_tile(hw, cin, cout, x_itemsize, vmem_budget=10 << 20):
    """Largest lane-dense tile (multiple of 128) dividing HW that keeps the double-buffered
    x / out / res blocks inside a conservative VMEM budget (v7x scoped VMEM is smaller)."""
    if hw % 128 != 0:
        return hw  # block must equal the full dim when not 128-divisible
    for cand in (4096, 2048, 1024, 512, 256, 128):
        if cand <= hw and hw % cand == 0:
            # double-buffered: x tile (input dtype) + out tile (f32) + res tile (f32)
            bytes_needed = 2 * cand * (cin * x_itemsize + 2 * cout * 4)
            if bytes_needed <= vmem_budget:
                return cand
    return 128


def tores_forward(params, x, w, res=None, *, mxu_dtype=jnp.bfloat16):
    """ToResLayer.forward.  x:[B,Cin,H,W] (NCHW), w:[B,w_dim] -> f32 [B,Cout,H,W].

    If `res` ([B,Cout,H,W]) is given, the residual add (res + tores(x, w)) is fused into the
    kernel and the residual buffer is aliased to the output.
    """
    B, Cin, H, W = x.shape
    w_dim = w.shape[-1]
    Cout = params["weight"].shape[0]
    HW = H * W

    hw_tile = _pick_hw_tile(HW, Cin, Cout, x.dtype.itemsize)
    n_hw = HW // hw_tile

    # No dtype cast of x in the wrapper (would cost an extra full HBM read+write of x);
    # the kernel casts in-register before the MXU.
    xr = x.reshape(B, Cin, HW)
    wlat = w.reshape(B, 1, w_dim).astype(jnp.float32)

    kernel = functools.partial(
        _tores_kernel,
        has_res=res is not None,
        clamp=params["fc_clamp"],
        mxu_dtype=mxu_dtype,
    )

    in_specs = [
        pl.BlockSpec((1, 1, w_dim), lambda b, h: (b, 0, 0)),       # latent
        pl.BlockSpec((w_dim, Cin), lambda b, h: (0, 0)),           # affine weight (pre-T, gains folded)
        pl.BlockSpec((1, Cin), lambda b, h: (0, 0)),               # affine bias (gains folded)
        pl.BlockSpec((1, Cin, hw_tile), lambda b, h: (b, 0, h)),   # x tile
        pl.BlockSpec((Cout, Cin), lambda b, h: (0, 0)),            # ToRes weight (shared)
        pl.BlockSpec((Cout, 1), lambda b, h: (0, 0)),              # ToRes bias
    ]
    args = [wlat, params["affine_w_t"], params["affine_b"], xr,
            params["weight"], params["bias"]]

    io_aliases = {}
    if res is not None:
        in_specs.append(pl.BlockSpec((1, Cout, hw_tile), lambda b, h: (b, 0, h)))
        args.append(res.reshape(B, Cout, HW).astype(jnp.float32))
        io_aliases = {len(args) - 1: 0}   # reuse the residual buffer for the output

    out = pl.pallas_call(
        kernel,
        out_shape=jax.ShapeDtypeStruct((B, Cout, HW), jnp.float32),
        grid=(B, n_hw),
        in_specs=in_specs,
        out_specs=pl.BlockSpec((1, Cout, hw_tile), lambda b, h: (b, 0, h)),
        input_output_aliases=io_aliases,
        compiler_params=pltpu.CompilerParams(
            dimension_semantics=("parallel", "parallel")),
    )(*args)
    return out.reshape(B, Cout, H, W)


# ----------------------------------------------------------------------------- #
# Parameter init (mirrors ToResLayer.__init__; all weight gains pre-folded)
# ----------------------------------------------------------------------------- #
def init_tores(key, in_channels, out_channels, w_dim, fc_clamp=None):
    k_aff, k_w = jax.random.split(key)
    affine_weight = jax.random.normal(k_aff, (in_channels, w_dim), jnp.float32)  # torch.randn([out,in])
    affine_bias = jnp.ones((in_channels,), jnp.float32)                          # bias_init=1
    weight = jax.random.normal(k_w, (out_channels, in_channels), jnp.float32)
    bias = jnp.zeros((out_channels,), jnp.float32)
    style_gain = 1.0 / math.sqrt(in_channels)                                    # ToResLayer.weight_gain
    fc_gain = 1.0 / math.sqrt(w_dim)                                             # FullyConnectedLayer.weight_gain
    return dict(
        # FC weight_gain + transpose + ToRes style gain folded in at init (zero per-call work).
        affine_w_t=(affine_weight * fc_gain).T * style_gain,     # (w_dim, Cin)
        affine_b=affine_bias.reshape(1, in_channels) * style_gain,  # (1, Cin)
        weight=weight,                                           # (Cout, Cin)
        bias=bias.reshape(out_channels, 1),                      # (Cout, 1)
        fc_clamp=fc_clamp,
    )


# ----------------------------------------------------------------------------- #
# Pure-JAX reference (for correctness check)
# ----------------------------------------------------------------------------- #
def tores_reference(params, x, w, res=None):
    styles = w @ params["affine_w_t"] + params["affine_b"]                     # [B, Cin] (gains folded)
    w_mod = params["weight"][None] * styles[:, None, :]                        # [B, Cout, Cin]
    y = jnp.einsum("nihw,noi->nohw", x.astype(jnp.float32), w_mod)
    y = y + params["bias"].reshape(1, -1, 1, 1)
    if params["fc_clamp"] is not None:
        y = jnp.clip(y, -params["fc_clamp"], params["fc_clamp"])
    if res is not None:
        y = y + res
    return y


# ----------------------------------------------------------------------------- #
# Demo
# ----------------------------------------------------------------------------- #
if __name__ == "__main__":
    B, Cin, Cout = 2, 16, 8
    H = W = 16
    w_dim = 32
    fc_clamp = 256.0

    key = jax.random.PRNGKey(0)
    kp, kx, kw, kr = jax.random.split(key, 4)
    params = init_tores(kp, Cin, Cout, w_dim, fc_clamp=fc_clamp)
    x = jax.random.normal(kx, (B, Cin, H, W), jnp.float32)
    wlat = jax.random.normal(kw, (B, w_dim), jnp.float32)
    res = jax.random.normal(kr, (B, Cout, H, W), jnp.float32)

    # Plain ToResLayer forward.
    out = jax.block_until_ready(tores_forward(params, x, wlat))
    assert out.shape == (B, Cout, H, W) and out.dtype == jnp.float32
    ref = tores_reference(params, x, wlat)
    rel = float(jnp.max(jnp.abs(out - ref)) / (jnp.max(jnp.abs(ref)) + 1e-6))
    assert rel < 2e-2, f"plain mismatch: rel err {rel}"

    # Fused residual-accumulate variant (res + tores(x, w)); res not used after this call.
    ref_res = tores_reference(params, x, wlat, res=res)
    out_res = jax.block_until_ready(tores_forward(params, x, wlat, res=res))
    assert out_res.shape == (B, Cout, H, W) and out_res.dtype == jnp.float32
    rel_r = float(jnp.max(jnp.abs(out_res - ref_res)) / (jnp.max(jnp.abs(ref_res)) + 1e-6))
    assert rel_r < 2e-2, f"fused-residual mismatch: rel err {rel_r}"

    print("KERNEL_OK")
</pallas_src>

<mosaic_0001>
module attributes {stable_mosaic.version = 11 : i64} {
  func.func @_tores_kernel(%arg0: i32, %arg1: i32, %arg2: memref<1x1x32xf32, #tpu.memory_space<vmem>>, %arg3: memref<32x16xf32, #tpu.memory_space<vmem>>, %arg4: memref<1x16xf32, #tpu.memory_space<vmem>>, %arg5: memref<1x16x256xf32, #tpu.memory_space<vmem>>, %arg6: memref<8x16xf32, #tpu.memory_space<vmem>>, %arg7: memref<8x1xf32, #tpu.memory_space<vmem>>, %arg8: memref<1x8x256xf32, #tpu.memory_space<vmem>>) attributes {dimension_semantics = [#tpu.dimension_semantics<parallel>, #tpu.dimension_semantics<parallel>], iteration_bounds = array<i64: 2, 1>, scalar_prefetch = 0 : i64, scratch_operands = 0 : i64, tpu.core_type = #tpu.core_type<tc>, window_params = [{transform_indices = @transform_0, window_bounds = array<i64: 1, 1, 32>}, {pipeline_mode = #tpu.pipeline_mode<synchronous>, transform_indices = @transform_1, window_bounds = array<i64: 32, 16>}, {pipeline_mode = #tpu.pipeline_mode<synchronous>, transform_indices = @transform_2, window_bounds = array<i64: 1, 16>}, {transform_indices = @transform_3, window_bounds = array<i64: 1, 16, 256>}, {pipeline_mode = #tpu.pipeline_mode<synchronous>, transform_indices = @transform_4, window_bounds = array<i64: 8, 16>}, {pipeline_mode = #tpu.pipeline_mode<synchronous>, transform_indices = @transform_5, window_bounds = array<i64: 8, 1>}, {transform_indices = @transform_6, window_bounds = array<i64: 1, 8, 256>}]} {
    %c0 = arith.constant 0 : index
    %c0_0 = arith.constant 0 : index
    %c0_1 = arith.constant 0 : index
    %0 = vector.load %arg2[%c0, %c0_0, %c0_1] : memref<1x1x32xf32, #tpu.memory_space<vmem>>, vector<1x1x32xf32>
    %1 = vector.shape_cast %0 : vector<1x1x32xf32> to vector<1x32xf32>
    %c0_2 = arith.constant 0 : index
    %c0_3 = arith.constant 0 : index
    %2 = vector.load %arg3[%c0_2, %c0_3] : memref<32x16xf32, #tpu.memory_space<vmem>>, vector<32x16xf32>
    %cst = arith.constant dense<0.000000e+00> : vector<1x16xf32>
    %3 = tpu.matmul %1, %2, %cst {dimension_numbers = #tpu.dot_dimension_numbers<[1], [0], [0], [1], [0, 0, 1, 1], [], []>} : vector<1x32xf32>, vector<32x16xf32>, vector<1x16xf32> -> vector<1x16xf32>
    %c0_4 = arith.constant 0 : index
    %c0_5 = arith.constant 0 : index
    %4 = vector.load %arg4[%c0_4, %c0_5] : memref<1x16xf32, #tpu.memory_space<vmem>>, vector<1x16xf32>
    %5 = arith.addf %3, %4 : vector<1x16xf32>
    %c0_6 = arith.constant 0 : index
    %c0_7 = arith.constant 0 : index
    %6 = vector.load %arg6[%c0_6, %c0_7] : memref<8x16xf32, #tpu.memory_space<vmem>>, vector<8x16xf32>
    %7 = vector.broadcast %5 : vector<1x16xf32> to vector<8x16xf32>
    %8 = arith.mulf %6, %7 : vector<8x16xf32>
    %9 = arith.truncf %8 : vector<8x16xf32> to vector<8x16xbf16>
    %c0_8 = arith.constant 0 : index
    %c0_9 = arith.constant 0 : index
    %c0_10 = arith.constant 0 : index
    %10 = vector.load %arg5[%c0_8, %c0_9, %c0_10] : memref<1x16x256xf32, #tpu.memory_space<vmem>>, vector<1x16x256xf32>
    %11 = vector.shape_cast %10 : vector<1x16x256xf32> to vector<16x256xf32>
    %12 = arith.truncf %11 : vector<16x256xf32> to vector<16x256xbf16>
    %cst_11 = arith.constant dense<0.000000e+00> : vector<8x256xf32>
    %13 = tpu.matmul %9, %12, %cst_11 {dimension_numbers = #tpu.dot_dimension_numbers<[1], [0], [0], [1], [0, 0, 1, 1], [], []>} : vector<8x16xbf16>, vector<16x256xbf16>, vector<8x256xf32> -> vector<8x256xf32>
    %c0_12 = arith.constant 0 : index
    %c0_13 = arith.constant 0 : index
    %14 = vector.load %arg7[%c0_12, %c0_13] : memref<8x1xf32, #tpu.memory_space<vmem>>, vector<8x1xf32>
    %15 = vector.broadcast %14 : vector<8x1xf32> to vector<8x256xf32>
    %16 = arith.addf %13, %15 : vector<8x256xf32>
    %cst_14 = arith.constant -2.560000e+02 : f32
    %cst_15 = arith.constant 2.560000e+02 : f32
    %17 = vector.broadcast %cst_14 : f32 to vector<8x256xf32>
    %18 = arith.maximumf %17, %16 : vector<8x256xf32>
    %19 = vector.broadcast %cst_15 : f32 to vector<8x256xf32>
    %20 = arith.minimumf %19, %18 : vector<8x256xf32>
    %c0_16 = arith.constant 0 : index
    %c0_17 = arith.constant 0 : index
    %c0_18 = arith.constant 0 : index
    %21 = vector.load %arg8[%c0_16, %c0_17, %c0_18] : memref<1x8x256xf32, #tpu.memory_space<vmem>>, vector<1x8x256xf32>
    %22 = vector.shape_cast %21 : vector<1x8x256xf32> to vector<8x256xf32>
    %23 = vector.shape_cast %20 : vector<8x256xf32> to vector<1x8x256xf32>
    tpu.vector_store %arg8[%c0_16, %c0_17, %c0_18], %23 {strides = array<i32>} : memref<1x8x256xf32, #tpu.memory_space<vmem>>, vector<1x8x256xf32>,
    return
  }
  func.func @transform_0(%arg0: i32, %arg1: i32) -> (i32, i32, i32) {
    %c0_i32 = arith.constant 0 : i32
    %c0_i32_0 = arith.constant 0 : i32
    %c0_i32_1 = arith.constant 0 : i32
    return %arg0, %c0_i32, %c0_i32_0 : i32, i32, i32
  }
  func.func @transform_1(%arg0: i32, %arg1: i32) -> (i32, i32) {
    %c0_i32 = arith.constant 0 : i32
    %c0_i32_0 = arith.constant 0 : i32
    %c0_i32_1 = arith.constant 0 : i32
    return %c0_i32, %c0_i32_0 : i32, i32
  }
  func.func @transform_2(%arg0: i32, %arg1: i32) -> (i32, i32) {
    %c0_i32 = arith.constant 0 : i32
    %c0_i32_0 = arith.constant 0 : i32
    %c0_i32_1 = arith.constant 0 : i32
    return %c0_i32, %c0_i32_0 : i32, i32
  }
  func.func @transform_3(%arg0: i32, %arg1: i32) -> (i32, i32, i32) {
    %c0_i32 = arith.constant 0 : i32
    %c0_i32_0 = arith.constant 0 : i32
    return %arg0, %c0_i32, %arg1 : i32, i32, i32
  }
  func.func @transform_4(%arg0: i32, %arg1: i32) -> (i32, i32) {
    %c0_i32 = arith.constant 0 : i32
    %c0_i32_0 = arith.constant 0 : i32
    %c0_i32_1 = arith.constant 0 : i32
    return %c0_i32, %c0_i32_0 : i32, i32
  }
  func.func @transform_5(%arg0: i32, %arg1: i32) -> (i32, i32) {
    %c0_i32 = arith.constant 0 : i32
    %c0_i32_0 = arith.constant 0 : i32
    %c0_i32_1 = arith.constant 0 : i32
    return %c0_i32, %c0_i32_0 : i32, i32
  }
  func.func @transform_6(%arg0: i32, %arg1: i32) -> (i32, i32, i32) {
    %c0_i32 = arith.constant 0 : i32
    %c0_i32_0 = arith.constant 0 : i32
    return %arg0, %c0_i32, %arg1 : i32, i32, i32
  }
}

</mosaic_0001>

<bundles_post_ra>
// kernel: tpu_custom_call.1
= control target key start
LH: loop header
LB: loop body
LE: loop exit
PB: predicated region body
PF: predicated region fallthrough
CT: control target
= control target key end

     0   :  { %11 = vsyncpa [#allocation3], 0  ;;  %s888_s0 = inlined_call_operand.vmem [shape: f32[2,1,32], index: 0, kind: input, shape index: {}]   ;;  %s889_s1 = inlined_call_operand.vmem [shape: f32[32,16], index: 1, kind: input, shape index: {}]   ;;  %s890_s2 = inlined_call_operand.vmem [shape: f32[1,16], index: 2, kind: input, shape index: {}]   ;;  %s891_s3 = inlined_call_operand.hbm [shape: f32[2,16,256], index: 3, kind: input, shape index: {}]   ;;  %s892_s4 = inlined_call_operand.vmem [shape: f32[8,16], index: 4, kind: input, shape index: {}]   ;;  %s893_s5 = inlined_call_operand.vmem [shape: f32[8,1], index: 5, kind: input, shape index: {}]   ;;  %s894_s6 = inlined_call_operand.hbm [shape: f32[2,8,256], index: 6, kind: output, shape index: {}]  }
   0x1   :  { %13 = vsyncpa [#allocation3 + $0x1], 0 }
   0x2   :  { %14 = vsyncpa [#allocation4], 0 }
   0x3   :  { %16 = vsyncpa [#allocation4 + $0x1], 0  ;;  %s741_s21 = smov 0   ;;  %s743_s22 = smov 0  }
   0x4   :  { %s745_s23 = smov 0   ;;  %s747_s24 = smov 0  }
   0x5   :  { %s749_s25 = smov 0   ;;  %s751_s26 = smov 0  }
   0x6 LB: > { %s501_s27 = sadd.s32 4294967295, %s701_s26   ;;  %s502_s28 = sadd.s32 4294967294, %s701_s26   ;;  %s701_s26 = sphi %s751_s26, %s22_s26   ;;  %s697_s25 = sphi %s749_s25, %s906_s25   ;;  %s693_s24 = sphi %s747_s24, %s905_s24   ;;  %s689_s23 = sphi %s745_s23, %s904_s23   ;;  %s685_s22 = sphi %s743_s22, %s903_s22   ;;  %s681_s21 = sphi %s741_s21, %s902_s21  }
   0x7   : > { %s34_s29 = sadd.s32 1, %s697_s25  ;;  %s111_s30 = sadd.s32 1, %s689_s23 }
   0x8   : > { %p36_p0 = scmp.ge.s32.totalorder %s34_s29, 2  ;;  %p118_p1 = scmp.ne.s32.totalorder %s689_s23, %s685_s22 }
   0x9   : > { %p119_p2 = scmp.eq.s32.totalorder %s701_s26, 0  ;;  %p124_p3 = scmp.ne.s32.totalorder %s685_s22, %s681_s21 }
   0xa   : > { %s908_s29 = smov (%p36_p0, %s34_s29), 0  ;;  %p125_p5 = scmp.eq.s32.totalorder %s501_s27, 0 }
   0xb   : > { %896 = sst [smem:[#allocation8_spill]] %s908_s29  ;;  %p782_p4 = por %p119_p2, %p118_p1 }
   0xc   : > { %s106_s8 = ssub.s32 %s697_s25, %s908_s29  ;;  %p192_p6 = scmp.eq.s32.totalorder %s501_s27, 1 }
   0xd   : > { %p109_p7 = scmp.eq.s32.totalorder %s106_s8, 0  ;;  %p788_p8 = por %p125_p5, %p124_p3 }
   0xe   : > { %p792_p9 = por %p192_p6, %p118_p1  ;;  %p198_p10 = scmp.eq.s32.totalorder %s502_s28, 1 }
   0xf   : > { %s797_s11 = scalar_select %p109_p7, %s689_s23, %s111_s30  }
  0x10   : > { %p799_p11 = por %p198_p10, %p124_p3  ;;  %p504_p12 = scmp.ge.s32.totalorder %s701_s26, 2 }
  0x11   : > { %p535_p13 = scmp.lt.s32.totalorder %s701_s26, 2  ;;  %s236_s13 = sand.u32 1, %s689_s23  }
  0x12   : > { %s505_s14 = sshll.u32 %s236_s13, 5  ;;  %s521_s15 = sshll.u32 %s697_s25, 5 }
  0x13   : > { %s247_s18 = scalar_lea.hbm %s891_s3, %s521_s15  ;;  %s240_s19 = scalar_lea.vmem [#allocation2], %s505_s14 }
  0x14   : > { %s250_s20 = sshll.u32 %s240_s19, 4  ;;  %s248_s27 = sshll.u32 %s247_s18, 4  ;;  %s251_s20 = int_to_ptr.vmem [resolvable:$true] %s250_s20  ;;  %s249_s27 = int_to_ptr.hbm [resolvable:$true] %s248_s27 }
  0x15   : > { %p528_p0 = pnand %p535_p13, %p782_p4  ;;  %p508_p1 = scmp.ge.s32.totalorder %s701_s26, 1 }
  0x16   : > { %s237_s28 = scalar_lea.sflag [#allocation3], %s236_s13  ;;  %s703_s30 = smov 256  }
  0x17   : > { %s704_s8 = smov 16   ;;  %p258_p2 = scmp.lt.s32.totalorder %s701_s26, 3 }
  0x18   : > { %530 = dma.hbm_to_vmem [thread:$0]  (!%p528_p0), %s249_s27, 512, %s251_s20, %s237_s28, %s703_s30, %s703_s30, %s704_s8  }
  0x19   : > { %p259_p3 = pnand %p508_p1, %p258_p2 }
  0x1a   : > { %s815_s29 = sand.u32 (!%p259_p3), 1, %s685_s22  }
  0x1b   : > { %262 = sbr.rel (%p259_p3) target bundleno = 315 (0x13b), region = 44  ;;  %s509_s14 = sshll.u32 (!%p259_p3), %s815_s29, 5 }
  0x1c   : > { %s265_s15 = scalar_lea.sflag (!%p259_p3), [#allocation3], %s815_s29  ;;  %s268_s16 = scalar_lea.vmem (!%p259_p3), [#allocation2], %s509_s14 }
  0x20   : > { %672 = dma.done.wait (%p788_p8), %s265_s15, 512  }
  0x21   : > { %674 = vsyncadd (%p788_p8), %s265_s15, 4294966784  ;;  %p301_p4 = scmp.lt.s32.totalorder %s693_s24, 1  ;;  %v311_v0 = vld [vmem:[%s889_s1 + $0x18] sm:$0xff]  ;;  %v310_v1 = vld [vmem:[%s889_s1 + $0x10] sm:$0xff]  ;;  %vm313_vm0 = vcmask 261120   ;;  %v705_v12 = vmov 0  }
  0x22   : > { %329 = vmatpush.msra.mxu0 %v311_v0  ;;  %v309_v2 = vld [vmem:[%s889_s1 + $0x8] sm:$0xff]  ;;  %v308_v3 = vld [vmem:[%s889_s1] sm:$0xff]  ;;  %v343_v6 = vld [vmem:[%s268_s16 + $0x10] sm:$0xff]  ;;  %588 = vset.pattern.permute.xlu0 %v705_v12  ;;  %vm353_vm1 = vcmask 130048   ;;  %s510_s19 = sshll.u32 %s815_s29, 4  ;;  %s522_s20 = sshll.u32 %s693_s24, 4 }
  0x23   : > { %s302_s7 = scalar_select %p301_p4, %s693_s24, 1  ;;  %v341_v5 = vld [vmem:[%s268_s16] sm:$0xff]  ;;  %v342_v7 = vld [vmem:[%s268_s16 + $0x8] sm:$0xff]  ;;  %v344_v9 = vld [vmem:[%s268_s16 + $0x18] sm:$0xff] }
  0x24   : > { %330 = vmatpush.msra.mxu0 %v310_v1  ;;  %v345_v8 = vpack.c.bf16 %v343_v6, %v341_v5  ;;  %v346_v10 = vpack.c.bf16 %v344_v9, %v342_v7  ;;  %v347_v11 = vld [vmem:[%s893_s5] sm:$0xff]  ;;  %s403_s9 = scalar_lea.hbm %s894_s6, %s522_s20  ;;  %s390_s15 = scalar_lea.sflag [#allocation4], %s815_s29 }
  0x25   : > { %s303_s30 = scalar_lea.vmem %s888_s0, %s302_s7  ;;  %350 = vperm.xlu0 %588, %v347_v11   ;;  %v312_v13 = vld [vmem:[%s890_s2] sm:$0x1]  ;;  %s407_s14 = sshll.u32 %s403_s9, 4  ;;  %s408_s14 = int_to_ptr.hbm [resolvable:$true] %s407_s14 }
  0x26   : > { %331 = vmatpush.msra.mxu0 %v309_v2  ;;  %v307_v4 = vld [vmem:[%s303_s30] sm:$0x1]  ;;  %364 = vmatpush.bf16.msra.mxu1 %v345_v8  ;;  %s300_s30 = scalar_lea.vmem [#allocation5], %s510_s19  ;;  %s633_s24 = sshra.s32 %s408_s14, 4  ;;  %s634_s24 = int_to_ptr.hbm [resolvable:$true] %s633_s24 }
  0x27   : > { %377 = vmatpush.bf16.msra.mxu2 %v346_v10  ;;  %v337_v16 = vld [vmem:[%s892_s4] sm:$0xff]  ;;  %s405_s8 = sshll.u32 %s300_s30, 4  ;;  %s635_s7 = scalar_lea.hbm %s634_s24, 16  ;;  %s406_s8 = int_to_ptr.vmem [resolvable:$true] %s405_s8 }
  0x28   : > { %332 = vmatpush.msra.mxu0 %v308_v3  ;;  %p636_p5 = scmp.ne.s32.totalorder %s634_s24, %s635_s7  ;;  %s639_s18 = scalar_lea.hbm %s894_s6, 32 }
  0x29   : > { %511 = vmatmul.msk.f32.vlgmr.msra.gmra.mxu0 %vm313_vm0, %v307_v4  ;;  %p640_p8 = scmp.lt.s32.totalorder %s634_s24, %s894_s6  ;;  %p641_p10 = scmp.lt.s32.totalorder %s639_s18, %s635_s7 }
  0x2a   : > { %p637_p6 = pnand %p636_p5, %p792_p9 }
  0x2b   : > { %p642_p13 = por %p641_p10, %p640_p8 }
  0x2c   : > { %p638_p7 = pneg %p637_p6 }
  0x2e   : > { %p643_p0 = pnand %p642_p13, %p638_p7 }
  0x97   : > { %v351_v20 = vpop.permute.xlu0 %350 }
  0xa6   : > { %v334_v14 = vpop.f32.mrf.mxu0 }
  0xa7   : > { %v335_v15 = vadd.f32 %v334_v14, %v312_v13 }
  0xa9   : > { %v338_v17 = vperm.slane %v335_v15, 0 }
  0xab   : > { %v339_v18 = vmul.f32 %v338_v17, %v337_v16 }
  0xad   : > { %v340_v19 = vpack.c.bf16 %v339_v18, %v339_v18 }
  0xaf   : > { %512 = vmatmul.msk.bf16.vlgmr.msra.gmra.mxu1 %vm353_vm1, %v340_v19  ;;  %513 = vmatmul.msk.bf16.vlgmr.msra.gmra.mxu2 %vm353_vm1, %v340_v19 }
 0x12c   : > { %v366_v21 = vpop.f32.mrf.mxu1 }
 0x12d   : > { %v367_v22 = vadd.f32 %v366_v21, %v351_v20 }
 0x12f   : > { %v514_v23 = vclamps-f32 %v367_v22, 256.0 }
 0x131   : > { %387 = vst [vmem:[%s300_s30] sm:$0xff] %v514_v23 }
 0x132   : > { %v379_v24 = vpop.f32.mrf.mxu2 }
 0x133   : > { %v380_v25 = vadd.f32 %v379_v24, %v351_v20 }
 0x134   : > { %v368_v26 = vpop.f32.mrf.mxu1 }
 0x135   : > { %v515_v27 = vclamps-f32 %v380_v25, 256.0 }
 0x137   : > { %388 = vst [vmem:[%s300_s30 + $0x8] sm:$0xff] %v515_v27 }
 0x138   : > { %646 = shalt.err (!%p643_p0)
}
 0x139   : > { %525 = dma.vmem_to_hbm [thread:$0]  (%p792_p9), %s406_s8, 256, %s408_s14, %s390_s15  }
 0x13a   : > { %v381_v28 = vpop.f32.mrf.mxu2 }
 0x13b PF: > { %s419_s29 = sand.u32 1, %s681_s21   ;;  %p532_p1 = pnand %p504_p12, %p799_p11 }
 0x13c   : > { %s420_s20 = scalar_lea.sflag [#allocation4], %s419_s29 }
 0x13d   : > { %p533_p2 = pneg %p532_p1 }
 0x13f   : > { %676 = dma.done.wait (%p533_p2), %s420_s20, 256  }
 0x140   : > { %678 = vsyncadd (%p533_p2), %s420_s20, 4294967040  ;;  %s22_s26 = sadd.s32 1, %s701_s26   ;;  %s901_s10 = sld [smem:[#allocation8_spill]] }
 0x141   : > { %p19_p3 = scmp.ge.s32.totalorder %s22_s26, 4   ;;  %s902_s21 = smov %s685_s22 }
 0x142   : > { %s903_s22 = smov %s689_s23  ;;  %s904_s23 = smov %s797_s11 }
 0x143   : > { %s905_s24 = smov %s697_s25  ;;  %21 = sbr.rel (!%p19_p3) target bundleno = 6 (0x6), region = 92 }
 0x146   : > { %s906_s25 = smov %s901_s10 }
 0x148   :  { %426 = vsyncpa [#allocation3], 1 }
 0x149   :  { %428 = vsyncpa [#allocation3 + $0x1], 1 }
 0x14a   :  { %429 = vsyncpa [#allocation4], 1 }
 0x14b   :  { %431 = vsyncpa [#allocation4 + $0x1], 1 }

</bundles_post_ra>
